<compile_context>
chip_gen: v6e
topology: v6e:2x2x1
jax: 0.10.0
libtpu: 0.0.40
codegen_flags: <defaults>
</compile_context>

<pallas_src>
import functools

import jax
import jax.numpy as jnp
from jax.experimental import pallas as pl
from jax.experimental.pallas import tpu as pltpu

STATE_DIM = 28   # fixed by the .reshape(len(x), 5, 28) in the reference forward
ACTION_DIM = 5   # fixed by the 5 opponent one-hot classes
HIDDEN = 64
OPP_ACTION_PROBS = (0.175, 0.175, 0.175, 0.175, 0.3)


def actor_kernel(xT_ref, w1xT_ref, w1oT_ref, b1_ref, w2T_ref, b2_ref,
                 w3T_ref, b3_ref, out_ref, *, batch):
    """One batch tile, batch on the lane axis.

    xT_ref   : (28, TB) bf16   state features, transposed (batch on lanes)
    w1xT_ref : (64, 28) bf16 ; w1oT_ref : (5, 64)->(64, 5) bf16 (fc1 split, transposed)
    w2T_ref  : (64, 64) bf16 ; w3T_ref  : (5, 64)  bf16 (transposed)
    b*_ref   : (out_dim, 1) f32 column biases
    out_ref  : (5, TB) f32     opponent-weighted action probabilities (transposed)
    batch    : static ORIGINAL (unpadded) batch size — needed by the torch one-hot quirk
    """
    tb = out_ref.shape[1]

    xT = xT_ref[...]                                              # (28, TB) bf16
    # fc1 state contribution + bias, once per tile (not once per slot)
    xwb = (jnp.dot(w1xT_ref[...], xT, preferred_element_type=jnp.float32)
           + b1_ref[...])                                         # (64, TB) f32

    # Torch one-hot quirk rebuilt in-kernel (no HBM stream, no integer division):
    #   onehot[b, i, j] = (j == (25*b + 5*i + j) // (5*B))
    #                   <=>  j*(5B-1) <= 25*b + 5*i < j*(5B-1) + 5B
    row0 = pl.program_id(0) * tb
    gb = row0 + jax.lax.broadcasted_iota(jnp.int32, (ACTION_DIM, tb), 1)  # global row / lane
    jj = jax.lax.broadcasted_iota(jnp.int32, (ACTION_DIM, tb), 0)         # class idx / sublane
    lo = jj * (ACTION_DIM * batch - 1)

    w1oT = w1oT_ref[...]                                          # (64, 5) bf16
    h1_slots = []
    for slot in range(ACTION_DIM):                                # static 5x unroll
        t = 25 * gb + ACTION_DIM * slot
        oh = jnp.where((lo <= t) & (t < lo + ACTION_DIM * batch),
                       1.0, 0.0).astype(jnp.bfloat16)             # (5, TB) one-hot^T
        h1 = xwb + jnp.dot(w1oT, oh, preferred_element_type=jnp.float32)
        h1_slots.append(jnp.maximum(h1, 0.0).astype(jnp.bfloat16))

    # Slot-batched fc2/fc3: one long matmul each (weights pushed once per tile).
    H1 = jnp.concatenate(h1_slots, axis=1)                        # (64, 5*TB) bf16
    H2 = jnp.dot(w2T_ref[...], H1, preferred_element_type=jnp.float32) + b2_ref[...]
    H2 = jnp.maximum(H2, 0.0).astype(jnp.bfloat16)                # (64, 5*TB)
    logits = (jnp.dot(w3T_ref[...], H2, preferred_element_type=jnp.float32)
              + b3_ref[...])                                      # (5, 5*TB) f32

    # softmax over the 5 action classes = sublane reduce (XLU)
    m = jnp.max(logits, axis=0, keepdims=True)
    e = jnp.exp(logits - m)
    probs = e * pl.reciprocal(jnp.sum(e, axis=0, keepdims=True), approx=True)

    # opponent-weighted accumulation over the 5 slots (lane-tile-aligned slices)
    acc = jnp.zeros((ACTION_DIM, tb), jnp.float32)
    for slot, w_opp in enumerate(OPP_ACTION_PROBS):
        acc = acc + jnp.float32(w_opp) * probs[:, slot * tb:(slot + 1) * tb]
    out_ref[...] = acc


def _round_up(v, m):
    return ((v + m - 1) // m) * m


def actor_forward(x, params, *, tile_b=128):
    """JAX/Pallas equivalent of Actor.forward. x: (B, 28) float32."""
    B = x.shape[0]
    w1, b1, w2, b2, w3, b3 = params

    # --- parameter prep: transposed bf16 weights (out_dim on sublanes), column biases ---
    w1xT = w1[:STATE_DIM].T.astype(jnp.bfloat16)        # (64, 28)  fc1 state part
    w1oT = w1[STATE_DIM:].T.astype(jnp.bfloat16)        # (64, 5)   fc1 one-hot part
    w2T = w2.T.astype(jnp.bfloat16)                     # (64, 64)
    w3T = w3.T.astype(jnp.bfloat16)                     # (5, 64)
    b1c = b1.reshape(HIDDEN, 1).astype(jnp.float32)
    b2c = b2.reshape(HIDDEN, 1).astype(jnp.float32)
    b3c = b3.reshape(ACTION_DIM, 1).astype(jnp.float32)

    # --- batch tiling: lane tile (multiple of 128); cap so that batches bigger than
    #     one minimal tile split into >=2 grid steps (v7x megacore sharding) ---
    tb = _round_up(max(1, tile_b), 128)
    if B > 128:
        tb = min(tb, max(128, _round_up(pl.cdiv(B, 2), 128)))
    b_pad = _round_up(B, tb)

    xT = x.T.astype(jnp.bfloat16)                       # (28, B), batch lane-dense
    if b_pad != B:
        xT = jnp.pad(xT, ((0, 0), (0, b_pad - B)))

    const = lambda t: (0, 0)                            # resident weights / biases
    out = pl.pallas_call(
        functools.partial(actor_kernel, batch=B),       # torch quirk uses ORIGINAL B
        out_shape=jax.ShapeDtypeStruct((ACTION_DIM, b_pad), jnp.float32),
        grid_spec=pltpu.PrefetchScalarGridSpec(
            num_scalar_prefetch=0,
            grid=(b_pad // tb,),
            in_specs=[
                pl.BlockSpec((STATE_DIM, tb), lambda t: (0, t)),   # x^T tile
                pl.BlockSpec((HIDDEN, STATE_DIM), const),          # w1^T (state part)
                pl.BlockSpec((HIDDEN, ACTION_DIM), const),         # w1^T (one-hot part)
                pl.BlockSpec((HIDDEN, 1), const),                  # b1
                pl.BlockSpec((HIDDEN, HIDDEN), const),             # w2^T
                pl.BlockSpec((HIDDEN, 1), const),                  # b2
                pl.BlockSpec((ACTION_DIM, HIDDEN), const),         # w3^T
                pl.BlockSpec((ACTION_DIM, 1), const),              # b3
            ],
            out_specs=pl.BlockSpec((ACTION_DIM, tb), lambda t: (0, t)),
        ),
        compiler_params=pltpu.CompilerParams(
            dimension_semantics=("parallel",)),         # megacore-shard batch tiles
    )(xT, w1xT, w1oT, b1c, w2T, b2c, w3T, b3c)

    actions_probs = out[:, :B].T                        # back to (B, 5)

    # --- scalar side-outputs (constants in the reference code; no kernel needed) ---
    opp = jnp.array(OPP_ACTION_PROBS, jnp.float32)
    prey = jnp.array(OPP_ACTION_PROBS, jnp.float32)
    opp_action_entropy = -jnp.sum(opp * jnp.log(opp))
    # F.kl_div(log(p), q, reduction='sum') = sum(q * (log(q) - log(p)))  (== 0 here)
    acc = jnp.sum(prey * (jnp.log(prey) - jnp.log(opp)))

    return actions_probs, acc, opp_action_entropy


def init_params(key):
    """Deterministic init matching nn.Linear shapes (uniform +-1/sqrt(fan_in))."""
    def linear(key, fan_in, fan_out):
        k1, k2 = jax.random.split(key)
        bound = 1.0 / jnp.sqrt(fan_in)
        w = jax.random.uniform(k1, (fan_in, fan_out), jnp.float32, -bound, bound)
        b = jax.random.uniform(k2, (1, fan_out), jnp.float32, -bound, bound)
        return w, b

    k1, k2, k3 = jax.random.split(key, 3)
    w1, b1 = linear(k1, STATE_DIM + ACTION_DIM, HIDDEN)
    w2, b2 = linear(k2, HIDDEN, HIDDEN)
    w3, b3 = linear(k3, HIDDEN, ACTION_DIM)
    return (w1, b1, w2, b2, w3, b3)


def actor_forward_ref(x, params):
    """Pure-JAX f32 reference (exact torch semantics) for correctness checking."""
    B = x.shape[0]
    w1, b1, w2, b2, w3, b3 = params
    x_tiled = jnp.broadcast_to(x[:, None, :], (B, 5, STATE_DIM))
    b_idx = jnp.arange(B)[:, None, None]
    i_idx = jnp.arange(5)[None, :, None]
    j_idx = jnp.arange(5)[None, None, :]
    k = 25 * b_idx + 5 * i_idx + j_idx
    opp_onehot = (j_idx == (k // (5 * B))).astype(jnp.float32)
    a = jnp.concatenate([x_tiled, opp_onehot], axis=2)
    h1 = jax.nn.relu(a @ w1 + b1)
    h2 = jax.nn.relu(h1 @ w2 + b2)
    probs = jax.nn.softmax(h2 @ w3 + b3, axis=-1)            # (B, 5, 5)
    opp = jnp.array(OPP_ACTION_PROBS, jnp.float32)
    return jnp.einsum("i,bij->bj", opp, probs)


if __name__ == "__main__":
    key = jax.random.PRNGKey(0)
    pkey, xkey, xkey2 = jax.random.split(key, 3)
    params = init_params(pkey)

    # Small shape consistent with the module (batch=2, state_dim=28).
    B = 2
    x = jax.random.normal(xkey, (B, STATE_DIM), dtype=jnp.float32)
    actions_probs, acc, entropy = actor_forward(x, params)
    jax.block_until_ready((actions_probs, acc, entropy))

    ref = actor_forward_ref(x, params)
    assert actions_probs.shape == (B, ACTION_DIM)
    # bf16 matmuls + approx reciprocal -> loosened (but still tight) tolerance
    assert jnp.allclose(actions_probs, ref, atol=2e-2, rtol=2e-2)
    assert jnp.allclose(jnp.sum(actions_probs, axis=-1), 1.0, atol=1e-2)
    assert jnp.allclose(acc, 0.0, atol=1e-6)
    assert bool(jnp.isfinite(entropy))

    # Larger batch: exercises the batch grid (2 tiles), lane padding and the
    # B-dependent in-kernel one-hot quirk.
    B2 = 200
    x2 = jax.random.normal(xkey2, (B2, STATE_DIM), dtype=jnp.float32)
    out2, _, _ = actor_forward(x2, params, tile_b=128)
    jax.block_until_ready(out2)
    ref2 = actor_forward_ref(x2, params)
    assert out2.shape == (B2, ACTION_DIM)
    assert jnp.allclose(out2, ref2, atol=2e-2, rtol=2e-2)

    print("KERNEL_OK")
</pallas_src>

<mosaic_0001>
module attributes {stable_mosaic.version = 11 : i64} {
  func.func @actor_kernel(%arg0: i32, %arg1: memref<28x128xbf16, #tpu.memory_space<vmem>>, %arg2: memref<64x28xbf16, #tpu.memory_space<vmem>>, %arg3: memref<64x5xbf16, #tpu.memory_space<vmem>>, %arg4: memref<64x1xf32, #tpu.memory_space<vmem>>, %arg5: memref<64x64xbf16, #tpu.memory_space<vmem>>, %arg6: memref<64x1xf32, #tpu.memory_space<vmem>>, %arg7: memref<5x64xbf16, #tpu.memory_space<vmem>>, %arg8: memref<5x1xf32, #tpu.memory_space<vmem>>, %arg9: memref<5x128xf32, #tpu.memory_space<vmem>>) attributes {dimension_semantics = [#tpu.dimension_semantics<parallel>], iteration_bounds = array<i64: 1>, scalar_prefetch = 0 : i64, scratch_operands = 0 : i64, tpu.core_type = #tpu.core_type<tc>, window_params = [{transform_indices = @transform_0, window_bounds = array<i64: 28, 128>}, {pipeline_mode = #tpu.pipeline_mode<synchronous>, transform_indices = @transform_1, window_bounds = array<i64: 64, 28>}, {pipeline_mode = #tpu.pipeline_mode<synchronous>, transform_indices = @transform_2, window_bounds = array<i64: 64, 5>}, {pipeline_mode = #tpu.pipeline_mode<synchronous>, transform_indices = @transform_3, window_bounds = array<i64: 64, 1>}, {pipeline_mode = #tpu.pipeline_mode<synchronous>, transform_indices = @transform_4, window_bounds = array<i64: 64, 64>}, {pipeline_mode = #tpu.pipeline_mode<synchronous>, transform_indices = @transform_5, window_bounds = array<i64: 64, 1>}, {pipeline_mode = #tpu.pipeline_mode<synchronous>, transform_indices = @transform_6, window_bounds = array<i64: 5, 64>}, {pipeline_mode = #tpu.pipeline_mode<synchronous>, transform_indices = @transform_7, window_bounds = array<i64: 5, 1>}, {transform_indices = @transform_8, window_bounds = array<i64: 5, 128>}]} {
    %c0 = arith.constant 0 : index
    %c0_0 = arith.constant 0 : index
    %0 = vector.load %arg1[%c0, %c0_0] : memref<28x128xbf16, #tpu.memory_space<vmem>>, vector<28x128xbf16>
    %c0_1 = arith.constant 0 : index
    %c0_2 = arith.constant 0 : index
    %1 = vector.load %arg2[%c0_1, %c0_2] : memref<64x28xbf16, #tpu.memory_space<vmem>>, vector<64x28xbf16>
    %cst = arith.constant dense<0.000000e+00> : vector<64x128xf32>
    %2 = tpu.matmul %1, %0, %cst {dimension_numbers = #tpu.dot_dimension_numbers<[1], [0], [0], [1], [0, 0, 1, 1], [], []>} : vector<64x28xbf16>, vector<28x128xbf16>, vector<64x128xf32> -> vector<64x128xf32>
    %c0_3 = arith.constant 0 : index
    %c0_4 = arith.constant 0 : index
    %3 = vector.load %arg4[%c0_3, %c0_4] : memref<64x1xf32, #tpu.memory_space<vmem>>, vector<64x1xf32>
    %4 = vector.broadcast %3 : vector<64x1xf32> to vector<64x128xf32>
    %5 = arith.addf %2, %4 : vector<64x128xf32>
    %c128_i32 = arith.constant 128 : i32
    %6 = arith.muli %arg0, %c128_i32 : i32
    %7 = tpu.iota {dimensions = array<i32: 1>} : vector<5x128xi32>
    %8 = vector.broadcast %6 : i32 to vector<5x128xi32>
    %9 = arith.addi %8, %7 : vector<5x128xi32>
    %10 = tpu.iota {dimensions = array<i32: 0>} : vector<5x128xi32>
    %c9_i32 = arith.constant 9 : i32
    %11 = vector.broadcast %c9_i32 : i32 to vector<5x128xi32>
    %12 = arith.muli %10, %11 : vector<5x128xi32>
    %c0_5 = arith.constant 0 : index
    %c0_6 = arith.constant 0 : index
    %13 = vector.load %arg3[%c0_5, %c0_6] : memref<64x5xbf16, #tpu.memory_space<vmem>>, vector<64x5xbf16>
    %c25_i32 = arith.constant 25 : i32
    %14 = vector.broadcast %c25_i32 : i32 to vector<5x128xi32>
    %15 = arith.muli %14, %9 : vector<5x128xi32>
    %c0_i32 = arith.constant 0 : i32
    %16 = vector.broadcast %c0_i32 : i32 to vector<5x128xi32>
    %17 = arith.addi %15, %16 : vector<5x128xi32>
    %18 = arith.cmpi sle, %12, %17 : vector<5x128xi32>
    %c10_i32 = arith.constant 10 : i32
    %19 = vector.broadcast %c10_i32 : i32 to vector<5x128xi32>
    %20 = arith.addi %12, %19 : vector<5x128xi32>
    %21 = arith.cmpi slt, %17, %20 : vector<5x128xi32>
    %22 = arith.andi %18, %21 : vector<5x128xi1>
    %cst_7 = arith.constant 1.000000e+00 : f32
    %cst_8 = arith.constant 0.000000e+00 : f32
    %23 = vector.broadcast %cst_7 : f32 to vector<5x128xf32>
    %24 = vector.broadcast %cst_8 : f32 to vector<5x128xf32>
    %25 = arith.select %22, %23, %24 : vector<5x128xi1>, vector<5x128xf32>
    %26 = arith.truncf %25 : vector<5x128xf32> to vector<5x128xbf16>
    %cst_9 = arith.constant dense<0.000000e+00> : vector<64x128xf32>
    %27 = tpu.matmul %13, %26, %cst_9 {dimension_numbers = #tpu.dot_dimension_numbers<[1], [0], [0], [1], [0, 0, 1, 1], [], []>} : vector<64x5xbf16>, vector<5x128xbf16>, vector<64x128xf32> -> vector<64x128xf32>
    %28 = arith.addf %5, %27 : vector<64x128xf32>
    %cst_10 = arith.constant 0.000000e+00 : f32
    %29 = vector.broadcast %cst_10 : f32 to vector<64x128xf32>
    %30 = arith.maximumf %28, %29 : vector<64x128xf32>
    %31 = arith.truncf %30 : vector<64x128xf32> to vector<64x128xbf16>
    %c25_i32_11 = arith.constant 25 : i32
    %32 = vector.broadcast %c25_i32_11 : i32 to vector<5x128xi32>
    %33 = arith.muli %32, %9 : vector<5x128xi32>
    %c5_i32 = arith.constant 5 : i32
    %34 = vector.broadcast %c5_i32 : i32 to vector<5x128xi32>
    %35 = arith.addi %33, %34 : vector<5x128xi32>
    %36 = arith.cmpi sle, %12, %35 : vector<5x128xi32>
    %c10_i32_12 = arith.constant 10 : i32
    %37 = vector.broadcast %c10_i32_12 : i32 to vector<5x128xi32>
    %38 = arith.addi %12, %37 : vector<5x128xi32>
    %39 = arith.cmpi slt, %35, %38 : vector<5x128xi32>
    %40 = arith.andi %36, %39 : vector<5x128xi1>
    %cst_13 = arith.constant 1.000000e+00 : f32
    %cst_14 = arith.constant 0.000000e+00 : f32
    %41 = vector.broadcast %cst_13 : f32 to vector<5x128xf32>
    %42 = vector.broadcast %cst_14 : f32 to vector<5x128xf32>
    %43 = arith.select %40, %41, %42 : vector<5x128xi1>, vector<5x128xf32>
    %44 = arith.truncf %43 : vector<5x128xf32> to vector<5x128xbf16>
    %cst_15 = arith.constant dense<0.000000e+00> : vector<64x128xf32>
    %45 = tpu.matmul %13, %44, %cst_15 {dimension_numbers = #tpu.dot_dimension_numbers<[1], [0], [0], [1], [0, 0, 1, 1], [], []>} : vector<64x5xbf16>, vector<5x128xbf16>, vector<64x128xf32> -> vector<64x128xf32>
    %46 = arith.addf %5, %45 : vector<64x128xf32>
    %cst_16 = arith.constant 0.000000e+00 : f32
    %47 = vector.broadcast %cst_16 : f32 to vector<64x128xf32>
    %48 = arith.maximumf %46, %47 : vector<64x128xf32>
    %49 = arith.truncf %48 : vector<64x128xf32> to vector<64x128xbf16>
    %c25_i32_17 = arith.constant 25 : i32
    %50 = vector.broadcast %c25_i32_17 : i32 to vector<5x128xi32>
    %51 = arith.muli %50, %9 : vector<5x128xi32>
    %c10_i32_18 = arith.constant 10 : i32
    %52 = vector.broadcast %c10_i32_18 : i32 to vector<5x128xi32>
    %53 = arith.addi %51, %52 : vector<5x128xi32>
    %54 = arith.cmpi sle, %12, %53 : vector<5x128xi32>
    %c10_i32_19 = arith.constant 10 : i32
    %55 = vector.broadcast %c10_i32_19 : i32 to vector<5x128xi32>
    %56 = arith.addi %12, %55 : vector<5x128xi32>
    %57 = arith.cmpi slt, %53, %56 : vector<5x128xi32>
    %58 = arith.andi %54, %57 : vector<5x128xi1>
    %cst_20 = arith.constant 1.000000e+00 : f32
    %cst_21 = arith.constant 0.000000e+00 : f32
    %59 = vector.broadcast %cst_20 : f32 to vector<5x128xf32>
    %60 = vector.broadcast %cst_21 : f32 to vector<5x128xf32>
    %61 = arith.select %58, %59, %60 : vector<5x128xi1>, vector<5x128xf32>
    %62 = arith.truncf %61 : vector<5x128xf32> to vector<5x128xbf16>
    %cst_22 = arith.constant dense<0.000000e+00> : vector<64x128xf32>
    %63 = tpu.matmul %13, %62, %cst_22 {dimension_numbers = #tpu.dot_dimension_numbers<[1], [0], [0], [1], [0, 0, 1, 1], [], []>} : vector<64x5xbf16>, vector<5x128xbf16>, vector<64x128xf32> -> vector<64x128xf32>
    %64 = arith.addf %5, %63 : vector<64x128xf32>
    %cst_23 = arith.constant 0.000000e+00 : f32
    %65 = vector.broadcast %cst_23 : f32 to vector<64x128xf32>
    %66 = arith.maximumf %64, %65 : vector<64x128xf32>
    %67 = arith.truncf %66 : vector<64x128xf32> to vector<64x128xbf16>
    %c25_i32_24 = arith.constant 25 : i32
    %68 = vector.broadcast %c25_i32_24 : i32 to vector<5x128xi32>
    %69 = arith.muli %68, %9 : vector<5x128xi32>
    %c15_i32 = arith.constant 15 : i32
    %70 = vector.broadcast %c15_i32 : i32 to vector<5x128xi32>
    %71 = arith.addi %69, %70 : vector<5x128xi32>
    %72 = arith.cmpi sle, %12, %71 : vector<5x128xi32>
    %c10_i32_25 = arith.constant 10 : i32
    %73 = vector.broadcast %c10_i32_25 : i32 to vector<5x128xi32>
    %74 = arith.addi %12, %73 : vector<5x128xi32>
    %75 = arith.cmpi slt, %71, %74 : vector<5x128xi32>
    %76 = arith.andi %72, %75 : vector<5x128xi1>
    %cst_26 = arith.constant 1.000000e+00 : f32
    %cst_27 = arith.constant 0.000000e+00 : f32
    %77 = vector.broadcast %cst_26 : f32 to vector<5x128xf32>
    %78 = vector.broadcast %cst_27 : f32 to vector<5x128xf32>
    %79 = arith.select %76, %77, %78 : vector<5x128xi1>, vector<5x128xf32>
    %80 = arith.truncf %79 : vector<5x128xf32> to vector<5x128xbf16>
    %cst_28 = arith.constant dense<0.000000e+00> : vector<64x128xf32>
    %81 = tpu.matmul %13, %80, %cst_28 {dimension_numbers = #tpu.dot_dimension_numbers<[1], [0], [0], [1], [0, 0, 1, 1], [], []>} : vector<64x5xbf16>, vector<5x128xbf16>, vector<64x128xf32> -> vector<64x128xf32>
    %82 = arith.addf %5, %81 : vector<64x128xf32>
    %cst_29 = arith.constant 0.000000e+00 : f32
    %83 = vector.broadcast %cst_29 : f32 to vector<64x128xf32>
    %84 = arith.maximumf %82, %83 : vector<64x128xf32>
    %85 = arith.truncf %84 : vector<64x128xf32> to vector<64x128xbf16>
    %c25_i32_30 = arith.constant 25 : i32
    %86 = vector.broadcast %c25_i32_30 : i32 to vector<5x128xi32>
    %87 = arith.muli %86, %9 : vector<5x128xi32>
    %c20_i32 = arith.constant 20 : i32
    %88 = vector.broadcast %c20_i32 : i32 to vector<5x128xi32>
    %89 = arith.addi %87, %88 : vector<5x128xi32>
    %90 = arith.cmpi sle, %12, %89 : vector<5x128xi32>
    %c10_i32_31 = arith.constant 10 : i32
    %91 = vector.broadcast %c10_i32_31 : i32 to vector<5x128xi32>
    %92 = arith.addi %12, %91 : vector<5x128xi32>
    %93 = arith.cmpi slt, %89, %92 : vector<5x128xi32>
    %94 = arith.andi %90, %93 : vector<5x128xi1>
    %cst_32 = arith.constant 1.000000e+00 : f32
    %cst_33 = arith.constant 0.000000e+00 : f32
    %95 = vector.broadcast %cst_32 : f32 to vector<5x128xf32>
    %96 = vector.broadcast %cst_33 : f32 to vector<5x128xf32>
    %97 = arith.select %94, %95, %96 : vector<5x128xi1>, vector<5x128xf32>
    %98 = arith.truncf %97 : vector<5x128xf32> to vector<5x128xbf16>
    %cst_34 = arith.constant dense<0.000000e+00> : vector<64x128xf32>
    %99 = tpu.matmul %13, %98, %cst_34 {dimension_numbers = #tpu.dot_dimension_numbers<[1], [0], [0], [1], [0, 0, 1, 1], [], []>} : vector<64x5xbf16>, vector<5x128xbf16>, vector<64x128xf32> -> vector<64x128xf32>
    %100 = arith.addf %5, %99 : vector<64x128xf32>
    %cst_35 = arith.constant 0.000000e+00 : f32
    %101 = vector.broadcast %cst_35 : f32 to vector<64x128xf32>
    %102 = arith.maximumf %100, %101 : vector<64x128xf32>
    %103 = arith.truncf %102 : vector<64x128xf32> to vector<64x128xbf16>
    %104 = tpu.concatenate %31, %49, %67, %85, %103 in 1 : vector<64x128xbf16>, vector<64x128xbf16>, vector<64x128xbf16>, vector<64x128xbf16>, vector<64x128xbf16> -> vector<64x640xbf16>
    %c0_36 = arith.constant 0 : index
    %c0_37 = arith.constant 0 : index
    %105 = vector.load %arg5[%c0_36, %c0_37] : memref<64x64xbf16, #tpu.memory_space<vmem>>, vector<64x64xbf16>
    %cst_38 = arith.constant dense<0.000000e+00> : vector<64x640xf32>
    %106 = tpu.matmul %105, %104, %cst_38 {dimension_numbers = #tpu.dot_dimension_numbers<[1], [0], [0], [1], [0, 0, 1, 1], [], []>} : vector<64x64xbf16>, vector<64x640xbf16>, vector<64x640xf32> -> vector<64x640xf32>
    %c0_39 = arith.constant 0 : index
    %c0_40 = arith.constant 0 : index
    %107 = vector.load %arg6[%c0_39, %c0_40] : memref<64x1xf32, #tpu.memory_space<vmem>>, vector<64x1xf32>
    %108 = vector.broadcast %107 : vector<64x1xf32> to vector<64x640xf32>
    %109 = arith.addf %106, %108 : vector<64x640xf32>
    %cst_41 = arith.constant 0.000000e+00 : f32
    %110 = vector.broadcast %cst_41 : f32 to vector<64x640xf32>
    %111 = arith.maximumf %109, %110 : vector<64x640xf32>
    %112 = arith.truncf %111 : vector<64x640xf32> to vector<64x640xbf16>
    %c0_42 = arith.constant 0 : index
    %c0_43 = arith.constant 0 : index
    %113 = vector.load %arg7[%c0_42, %c0_43] : memref<5x64xbf16, #tpu.memory_space<vmem>>, vector<5x64xbf16>
    %cst_44 = arith.constant dense<0.000000e+00> : vector<5x640xf32>
    %114 = tpu.matmul %113, %112, %cst_44 {dimension_numbers = #tpu.dot_dimension_numbers<[1], [0], [0], [1], [0, 0, 1, 1], [], []>} : vector<5x64xbf16>, vector<64x640xbf16>, vector<5x640xf32> -> vector<5x640xf32>
    %c0_45 = arith.constant 0 : index
    %c0_46 = arith.constant 0 : index
    %115 = vector.load %arg8[%c0_45, %c0_46] : memref<5x1xf32, #tpu.memory_space<vmem>>, vector<5x1xf32>
    %116 = vector.broadcast %115 : vector<5x1xf32> to vector<5x640xf32>
    %117 = arith.addf %114, %116 : vector<5x640xf32>
    %cst_47 = arith.constant dense<0xFF800000> : vector<640xf32>
    %118 = vector.multi_reduction <maximumf>, %117, %cst_47 [0] : vector<5x640xf32> to vector<640xf32>
    %119 = vector.shape_cast %118 : vector<640xf32> to vector<1x640xf32>
    %120 = vector.broadcast %119 : vector<1x640xf32> to vector<5x640xf32>
    %121 = arith.subf %117, %120 : vector<5x640xf32>
    %122 = math.exp %121 : vector<5x640xf32>
    %cst_48 = arith.constant dense<0.000000e+00> : vector<640xf32>
    %123 = vector.multi_reduction <add>, %122, %cst_48 [0] : vector<5x640xf32> to vector<640xf32>
    %124 = vector.shape_cast %123 : vector<640xf32> to vector<1x640xf32>
    %125 = tpu.reciprocal %124 {approx = true} : vector<1x640xf32> -> vector<1x640xf32>
    %126 = vector.broadcast %125 : vector<1x640xf32> to vector<5x640xf32>
    %127 = arith.mulf %122, %126 : vector<5x640xf32>
    %cst_49 = arith.constant 0.000000e+00 : f32
    %128 = vector.broadcast %cst_49 : f32 to vector<5x128xf32>
    %129 = vector.extract_strided_slice %127 {offsets = [0, 0], sizes = [5, 128], strides = [1, 1]} : vector<5x640xf32> to vector<5x128xf32>
    %cst_50 = arith.constant 1.750000e-01 : f32
    %130 = vector.broadcast %cst_50 : f32 to vector<5x128xf32>
    %131 = arith.mulf %130, %129 : vector<5x128xf32>
    %132 = arith.addf %128, %131 : vector<5x128xf32>
    %133 = vector.extract_strided_slice %127 {offsets = [0, 128], sizes = [5, 128], strides = [1, 1]} : vector<5x640xf32> to vector<5x128xf32>
    %cst_51 = arith.constant 1.750000e-01 : f32
    %134 = vector.broadcast %cst_51 : f32 to vector<5x128xf32>
    %135 = arith.mulf %134, %133 : vector<5x128xf32>
    %136 = arith.addf %132, %135 : vector<5x128xf32>
    %137 = vector.extract_strided_slice %127 {offsets = [0, 256], sizes = [5, 128], strides = [1, 1]} : vector<5x640xf32> to vector<5x128xf32>
    %cst_52 = arith.constant 1.750000e-01 : f32
    %138 = vector.broadcast %cst_52 : f32 to vector<5x128xf32>
    %139 = arith.mulf %138, %137 : vector<5x128xf32>
    %140 = arith.addf %136, %139 : vector<5x128xf32>
    %141 = vector.extract_strided_slice %127 {offsets = [0, 384], sizes = [5, 128], strides = [1, 1]} : vector<5x640xf32> to vector<5x128xf32>
    %cst_53 = arith.constant 1.750000e-01 : f32
    %142 = vector.broadcast %cst_53 : f32 to vector<5x128xf32>
    %143 = arith.mulf %142, %141 : vector<5x128xf32>
    %144 = arith.addf %140, %143 : vector<5x128xf32>
    %145 = vector.extract_strided_slice %127 {offsets = [0, 512], sizes = [5, 128], strides = [1, 1]} : vector<5x640xf32> to vector<5x128xf32>
    %cst_54 = arith.constant 3.000000e-01 : f32
    %146 = vector.broadcast %cst_54 : f32 to vector<5x128xf32>
    %147 = arith.mulf %146, %145 : vector<5x128xf32>
    %148 = arith.addf %144, %147 : vector<5x128xf32>
    %c0_55 = arith.constant 0 : index
    %c0_56 = arith.constant 0 : index
    %149 = vector.load %arg9[%c0_55, %c0_56] : memref<5x128xf32, #tpu.memory_space<vmem>>, vector<5x128xf32>
    tpu.vector_store %arg9[%c0_55, %c0_56], %148 {strides = array<i32>} : memref<5x128xf32, #tpu.memory_space<vmem>>, vector<5x128xf32>,
    return
  }
  func.func @transform_0(%arg0: i32) -> (i32, i32) {
    %c0_i32 = arith.constant 0 : i32
    %c0_i32_0 = arith.constant 0 : i32
    return %c0_i32, %arg0 : i32, i32
  }
  func.func @transform_1(%arg0: i32) -> (i32, i32) {
    %c0_i32 = arith.constant 0 : i32
    %c0_i32_0 = arith.constant 0 : i32
    %c0_i32_1 = arith.constant 0 : i32
    return %c0_i32, %c0_i32_0 : i32, i32
  }
  func.func @transform_2(%arg0: i32) -> (i32, i32) {
    %c0_i32 = arith.constant 0 : i32
    %c0_i32_0 = arith.constant 0 : i32
    %c0_i32_1 = arith.constant 0 : i32
    return %c0_i32, %c0_i32_0 : i32, i32
  }
  func.func @transform_3(%arg0: i32) -> (i32, i32) {
    %c0_i32 = arith.constant 0 : i32
    %c0_i32_0 = arith.constant 0 : i32
    %c0_i32_1 = arith.constant 0 : i32
    return %c0_i32, %c0_i32_0 : i32, i32
  }
  func.func @transform_4(%arg0: i32) -> (i32, i32) {
    %c0_i32 = arith.constant 0 : i32
    %c0_i32_0 = arith.constant 0 : i32
    %c0_i32_1 = arith.constant 0 : i32
    return %c0_i32, %c0_i32_0 : i32, i32
  }
  func.func @transform_5(%arg0: i32) -> (i32, i32) {
    %c0_i32 = arith.constant 0 : i32
    %c0_i32_0 = arith.constant 0 : i32
    %c0_i32_1 = arith.constant 0 : i32
    return %c0_i32, %c0_i32_0 : i32, i32
  }
  func.func @transform_6(%arg0: i32) -> (i32, i32) {
    %c0_i32 = arith.constant 0 : i32
    %c0_i32_0 = arith.constant 0 : i32
    %c0_i32_1 = arith.constant 0 : i32
    return %c0_i32, %c0_i32_0 : i32, i32
  }
  func.func @transform_7(%arg0: i32) -> (i32, i32) {
    %c0_i32 = arith.constant 0 : i32
    %c0_i32_0 = arith.constant 0 : i32
    %c0_i32_1 = arith.constant 0 : i32
    return %c0_i32, %c0_i32_0 : i32, i32
  }
  func.func @transform_8(%arg0: i32) -> (i32, i32) {
    %c0_i32 = arith.constant 0 : i32
    %c0_i32_0 = arith.constant 0 : i32
    return %c0_i32, %arg0 : i32, i32
  }
}

</mosaic_0001>

<bundles_post_ra>
// kernel: tpu_custom_call.1
= control target key start
LH: loop header
LB: loop body
LE: loop exit
PB: predicated region body
PF: predicated region fallthrough
CT: control target
= control target key end

     0   :  { %v205_v1 = vlaneseq  ;;  %vm135_vm0 = vcmask 1045504   ;;  %vm122_vm1 = vcmask 228352   ;;  %vm260_vm2 = vcmask 1041408   ;;  %s2052_s0 = inlined_call_operand.vmem [shape: bf16[28,128], index: 0, kind: input, shape index: {}]   ;;  %s2053_s1 = inlined_call_operand.vmem [shape: bf16[64,28], index: 1, kind: input, shape index: {}]   ;;  %s2054_s2 = inlined_call_operand.vmem [shape: bf16[64,5], index: 2, kind: input, shape index: {}]   ;;  %s2055_s3 = inlined_call_operand.vmem [shape: f32[64,1], index: 3, kind: input, shape index: {}]   ;;  %s2056_s4 = inlined_call_operand.vmem [shape: bf16[64,64], index: 4, kind: input, shape index: {}]   ;;  %s2057_s5 = inlined_call_operand.vmem [shape: f32[64,1], index: 5, kind: input, shape index: {}]   ;;  %s2058_s6 = inlined_call_operand.vmem [shape: bf16[5,64], index: 6, kind: input, shape index: {}]   ;;  %s2059_s7 = inlined_call_operand.vmem [shape: f32[5,1], index: 7, kind: input, shape index: {}]   ;;  %s2060_s8 = inlined_call_operand.hbm [shape: f32[5,128], index: 8, kind: output, shape index: {}]  }
   0x1   :  { %v1536_v0 = vld [vmem:[%s2052_s0 + $0x8] sm:$0x3f]   ;;  %v1537_v2 = vld [vmem:[%s2052_s0] sm:$0xff]   ;;  %vm247_vm3 = vcmask 39936   ;;  %v1540_v11 = vld [vmem:[%s2053_s1 + $0x10] sm:$0xff]   ;;  %vm261_vm5 = vcmask 1042432  }
   0x2   :  { %1528 = vmatprep.subr.msk.bf16.mxu0 %vm135_vm0, %v1536_v0  ;;  %v137_v3 = vsel %vm135_vm0, %v1536_v0, 0  ;;  %v1538_v4 = vld [vmem:[%s2053_s1] sm:$0xff]   ;;  %v206_v5 = vand.u32 127, %v205_v1  ;;  %v210_v6 = vshrl.u32 %v205_v1, 7  ;;  %v1539_v7 = vld [vmem:[%s2053_s1 + $0x8] sm:$0xff]   ;;  %v1592_v13 = vmov 65535  }
   0x3   :  { %1439 = vmatpush3.bf16.msra.mxu0 %v137_v3  ;;  %1442 = vmatprep.mubr.msk.bf16.mxu0 %vm122_vm1, %v1538_v4  ;;  %v1658_v8 = vld [vmem:[%s2054_s2] sm:$0xff]   ;;  %v262_v14 = vsel %vm260_vm2, 4294967295, %v1592_v13  ;;  %v49_v18 = vld [vmem:[%s2055_s3 + $0x30] sm:$0xff]  ;;  %v1593_v19 = vmov 0.0   ;;  %v1594_v26 = vmov 0   ;;  %v1542_v27 = vld [vmem:[%s2053_s1 + $0x18] sm:$0xff]  }
   0x4   :  { %1440 = vmatprep.subr.bf16.mxu0 %v1537_v2  ;;  %v211_v9 = vmul.u32 9, %v210_v6  ;;  %v220_v10 = vmul.u32 25, %v206_v5  ;;  %1452 = vmatprep.mubr.msk.bf16.mxu1 %vm247_vm3, %v1658_v8  ;;  %v263_v21 = vsel %vm261_vm5, %v262_v14, 0  ;;  %v47_v23 = vld [vmem:[%s2055_s3 + $0x20] sm:$0xff]  ;;  %v1685_v34 = vld [vmem:[%s2054_s2 + $0x8] sm:$0xff]   ;;  %v1692_v37 = vld [vmem:[%s2054_s2 + $0x10] sm:$0xff]  }
   0x5   :  { %1534 = vset.pattern.permute.xlu0 %v1594_v26  ;;  %1535 = vset.pattern.permute.xlu1 %v1594_v26  ;;  %v50_v40 = vld [vmem:[%s2055_s3 + $0x38] sm:$0xff]  ;;  %v48_v43 = vld [vmem:[%s2055_s3 + $0x28] sm:$0xff] }
   0x6   :  { %vm221_vm4 = vcmp.le.s32.totalorder %v211_v9, %v220_v10  ;;  %v222_v12 = vadd.s32 10, %v211_v9  ;;  %v446_v15 = vadd.s32 10, %v220_v10  ;;  %v352_v16 = vadd.s32 5, %v220_v10  ;;  %83 = vperm.xlu0 %1534, %v49_v18   ;;  %73 = vperm.xlu1 %1535, %v47_v23  }
   0x7   :  { %1441 = vmatpush3.bf16.msra.mxu0 %v1537_v2  ;;  %v634_v17 = vadd.s32 20, %v220_v10  ;;  %v540_v22 = vadd.s32 15, %v220_v10 }
   0x8   :  { %vm223_vm6 = vcmp.lt.s32.totalorder %v220_v10, %v222_v12  ;;  %vm447_vm8 = vcmp.le.s32.totalorder %v211_v9, %v446_v15  ;;  %vm448_vm9 = vcmp.lt.s32.totalorder %v446_v15, %v222_v12  ;;  %vm353_vm11 = vcmp.le.s32.totalorder %v211_v9, %v352_v16 }
   0x9   :  { %vm224_vm7 = vmand %vm221_vm4, %vm223_vm6  ;;  %vm354_vm12 = vcmp.lt.s32.totalorder %v352_v16, %v222_v12  ;;  %vm635_vm14 = vcmp.le.s32.totalorder %v211_v9, %v634_v17  ;;  %vm636_vm15 = vcmp.lt.s32.totalorder %v634_v17, %v222_v12  ;;  %vm541_vm0 = vcmp.le.s32.totalorder %v211_v9, %v540_v22 }
   0xa   :  { %1443 = vmatmul.mubr.msk.bf16.vlgmr.msra.gmra.mxu0 %vm122_vm1, %v1539_v7  ;;  %v225_v20 = vsel %vm224_vm7, 1.0, %v1593_v19  ;;  %vm449_vm10 = vmand %vm447_vm8, %vm448_vm9  ;;  %vm542_vm4 = vcmp.lt.s32.totalorder %v540_v22, %v222_v12 }
   0xb   :  { %1446 = vmatprep.mubr.msk.bf16.mxu0 %vm122_vm1, %v1540_v11  ;;  %v226_v24 = vpack.c.bf16 %v225_v20, %v225_v20  ;;  %v450_v25 = vsel %vm449_vm10, 1.0, %v1593_v19  ;;  %vm355_vm13 = vmand %vm353_vm11, %vm354_vm12 }
   0xc   :  { %v451_v28 = vpack.c.bf16 %v450_v25, %v450_v25  ;;  %v356_v30 = vsel %vm355_vm13, 1.0, %v1593_v19  ;;  %vm637_vm2 = vmand %vm635_vm14, %vm636_vm15 }
   0xd   :  { %v265_v29 = vand.u32 %v263_v21, %v226_v24  ;;  %v357_v32 = vpack.c.bf16 %v356_v30, %v356_v30  ;;  %v638_v33 = vsel %vm637_vm2, 1.0, %v1593_v19  ;;  %vm543_vm5 = vmand %vm541_vm0, %vm542_vm4 }
   0xe   :  { %v453_v31 = vand.u32 %v451_v28, %v263_v21  ;;  %v639_v35 = vpack.c.bf16 %v638_v33, %v638_v33  ;;  %v544_v36 = vsel %vm543_vm5, 1.0, %v1593_v19 }
   0xf   :  { %1450 = vmatprep.subr.bf16.mxu1 %v265_v29  ;;  %v359_v38 = vand.u32 %v357_v32, %v263_v21  ;;  %v545_v39 = vpack.c.bf16 %v544_v36, %v544_v36 }
  0x10   :  { %1451 = vmatpush3.bf16.msra.mxu1 %v265_v29  ;;  %1470 = vmatprep.subr.bf16.mxu0 %v453_v31  ;;  %v641_v41 = vand.u32 %v639_v35, %v263_v21 }
  0x11   :  { %1471 = vmatpush3.bf16.msra.mxu0 %v453_v31  ;;  %1460 = vmatprep.subr.bf16.mxu1 %v359_v38  ;;  %v547_v42 = vand.u32 %v545_v39, %v263_v21 }
  0x12   :  { %1447 = vmatmul.mubr.msk.bf16.gmra.mxu0 %vm122_vm1, %v1542_v27  ;;  %1490 = vmatprep.subr.bf16.mxu0 %v641_v41 }
  0x13   :  { %1472 = vmatprep.mubr.msk.bf16.mxu0 %vm247_vm3, %v1658_v8  ;;  %1453 = vmatmul.mubr.msk.bf16.vlgmr.msra.gmra.mxu1 %vm247_vm3, %v1685_v34 }
  0x14   :  { %13 = vsyncpa [#allocation3], 0  ;;  %1456 = vmatprep.mubr.msk.bf16.mxu1 %vm247_vm3, %v1692_v37  ;;  %1461 = vmatpush3.bf16.msra.mxu1 %v359_v38  ;;  %v1545_v44 = vld [vmem:[%s2054_s2 + $0x18] sm:$0xff]   ;;  %v45_v45 = vld [vmem:[%s2055_s3 + $0x10] sm:$0xff]  ;;  %vm804_vm1 = vcmask 523264   ;;  %vm1220_vm6 = vcmask 1044480  }
  0x15   :  { %1480 = vmatprep.subr.bf16.mxu1 %v547_v42  ;;  %88 = vperm.xlu0 %1534, %v50_v40   ;;  %v46_v46 = vld [vmem:[%s2055_s3 + $0x18] sm:$0xff]  ;;  %v43_v47 = vld [vmem:[%s2055_s3] sm:$0xff]  ;;  %v44_v48 = vld [vmem:[%s2055_s3 + $0x8] sm:$0xff] }
  0x16   :  { %78 = vperm.xlu1 %1535, %v48_v43   ;;  %v742_v49 = vld [vmem:[%s2057_s5 + $0x30] sm:$0xff]  ;;  %v743_v50 = vld [vmem:[%s2057_s5 + $0x38] sm:$0xff]  ;;  %v740_v51 = vld [vmem:[%s2057_s5 + $0x20] sm:$0xff] }
  0x17   :  { %v741_v52 = vld [vmem:[%s2057_s5 + $0x28] sm:$0xff]  ;;  %v738_v53 = vld [vmem:[%s2057_s5 + $0x10] sm:$0xff]  ;;  %v739_v54 = vld [vmem:[%s2057_s5 + $0x18] sm:$0xff] }
  0x18   :  { %v736_v55 = vld [vmem:[%s2057_s5] sm:$0xff]  ;;  %v737_v56 = vld [vmem:[%s2057_s5 + $0x8] sm:$0xff] }
  0x19   :  { %63 = vperm.xlu0 %1534, %v45_v45   ;;  %v1089_v57 = vld [vmem:[%s2059_s7] sm:$0x1f] }
  0x1a   :  { %1473 = vmatmul.mubr.msk.bf16.vlgmr.msra.gmra.mxu0 %vm247_vm3, %v1685_v34  ;;  %68 = vperm.xlu1 %1535, %v46_v46  }
  0x1b   :  { %1476 = vmatprep.mubr.msk.bf16.mxu0 %vm247_vm3, %v1692_v37  ;;  %1491 = vmatpush3.bf16.msra.mxu0 %v641_v41 }
  0x1c   :  { %1457 = vmatmul.mubr.msk.bf16.gmra.mxu1 %vm247_vm3, %v1545_v44 }
  0x1d   :  { %1462 = vmatprep.mubr.msk.bf16.mxu1 %vm247_vm3, %v1658_v8  ;;  %53 = vperm.xlu0 %1534, %v43_v47  }
  0x1e   :  { %58 = vperm.xlu1 %1535, %v44_v48  }
  0x21   :  { %776 = vperm.xlu0 %1534, %v742_v49  }
  0x22   :  { %1477 = vmatmul.mubr.msk.bf16.gmra.mxu0 %vm247_vm3, %v1545_v44  ;;  %781 = vperm.xlu1 %1535, %v743_v50  }
  0x23   :  { %1492 = vmatprep.mubr.msk.bf16.mxu0 %vm247_vm3, %v1658_v8 }
  0x24   :  { %1463 = vmatmul.mubr.msk.bf16.vlgmr.msra.gmra.mxu1 %vm247_vm3, %v1685_v34 }
  0x25   :  { %1466 = vmatprep.mubr.msk.bf16.mxu1 %vm247_vm3, %v1692_v37  ;;  %1481 = vmatpush3.bf16.msra.mxu1 %v547_v42 }
  0x26   :  { %766 = vperm.xlu0 %1534, %v740_v51   ;;  %771 = vperm.xlu1 %1535, %v741_v52  }
  0x2a   :  { %1493 = vmatmul.mubr.msk.bf16.vlgmr.msra.gmra.mxu0 %vm247_vm3, %v1685_v34  ;;  %756 = vperm.xlu0 %1534, %v738_v53  }
  0x2b   :  { %1496 = vmatprep.mubr.msk.bf16.mxu0 %vm247_vm3, %v1692_v37  ;;  %761 = vperm.xlu1 %1535, %v739_v54  }
  0x2c   :  { %1467 = vmatmul.mubr.msk.bf16.gmra.mxu1 %vm247_vm3, %v1545_v44 }
  0x2d   :  { %1482 = vmatprep.mubr.msk.bf16.mxu1 %vm247_vm3, %v1658_v8 }
  0x2e   :  { %746 = vperm.xlu0 %1534, %v736_v55  }
  0x2f   :  { %751 = vperm.xlu1 %1535, %v737_v56  }
  0x32   :  { %1497 = vmatmul.mubr.msk.bf16.gmra.mxu0 %vm247_vm3, %v1545_v44  ;;  %1092 = vperm.xlu0 %1534, %v1089_v57  }
  0x33   :  { %922 = vmatprep.mubr.bf16.mxu0 %v1594_v26 }
  0x34   :  { %1483 = vmatmul.mubr.msk.bf16.vlgmr.msra.gmra.mxu1 %vm247_vm3, %v1685_v34 }
  0x35   :  { %1486 = vmatprep.mubr.msk.bf16.mxu1 %vm247_vm3, %v1692_v37 }
  0x3c   :  { %1487 = vmatmul.mubr.msk.bf16.gmra.mxu1 %vm247_vm3, %v1545_v44  ;;  %vm1595_vm3 = vmmov 0  }
  0x3d   :  { %849 = vmatprep.mubr.bf16.mxu1 %v1594_v26 }
  0x81   :  { %v74_v11 = vpop.permute.xlu1 %73  ;;  %v84_v14 = vpop.permute.xlu0 %83 }
  0x90   :  { %v89_v23 = vpop.permute.xlu0 %88 }
  0x91   :  { %v79_v20 = vpop.permute.xlu1 %78 }
  0x94   :  { %v64_v34 = vpop.permute.xlu0 %63 }
  0x95   :  { %v69_v30 = vpop.permute.xlu1 %68 }
  0x98   :  { %v54_v53 = vpop.permute.xlu0 %53 }
  0x99   :  { %v59_v45 = vpop.permute.xlu1 %58 }
  0xca   :  { %v1444_v58 = vpop.f32.mrf.mxu0 }
  0xcb   :  { %v1824_v49 = vadd.f32 %v1444_v58, %v64_v34 }
  0xcc   :  { %v1777_v59 = vpop.f32.mrf.mxu0 }
  0xce   :  { %v1445_v60 = vpop.f32.mrf.mxu0 }
  0xcf   :  { %v1820_v44 = vadd.f32 %v1445_v60, %v69_v30 }
  0xd0   :  { %v176_v61 = vpop.f32.mrf.mxu0 }
  0xd2   :  { %v1448_v62 = vpop.f32.mrf.mxu0 }
  0xd3   :  { %v1779_v0 = vpop.f32.mrf.mxu1  ;;  %v1807_v32 = vadd.f32 %v1448_v62, %v84_v14  ;;  %v1829_v62 = vadd.f32 %v176_v61, %v59_v45  ;;  %v1836_v14 = vadd.f32 %v1777_v59, %v54_v53 }
  0xd4   :  { %v189_v63 = vpop.f32.mrf.mxu0 }
  0xd5   :  { %v1781_v2 = vpop.f32.mrf.mxu1  ;;  %v1814_v39 = vadd.f32 %v189_v63, %v74_v11 }
  0xd6   :  { %v1449_v1 = vpop.f32.mrf.mxu0 }
  0xd7   :  { %v1455_v4 = vpop.f32.mrf.mxu1  ;;  %v1803_v28 = vadd.f32 %v1449_v1, %v89_v23 }
  0xd8   :  { %v192_v3 = vpop.f32.mrf.mxu0 }
  0xd9   :  { %v1785_v6 = vpop.f32.mrf.mxu1  ;;  %v1811_v36 = vadd.f32 %v192_v3, %v79_v20 }
  0xda   :  { %v1783_v5 = vpop.f32.mrf.mxu0  ;;  %v333_v34 = vadd.f32 %v1785_v6, %v1829_v62 }
  0xdc   :  { %v1787_v7 = vpop.f32.mrf.mxu0  ;;  %v1458_v8 = vpop.f32.mrf.mxu1 }
  0xdd   :  { %v338_v42 = vadd.f32 %v1458_v8, %v1807_v32 }
  0xde   :  { %v1789_v9 = vpop.f32.mrf.mxu0  ;;  %v317_v10 = vpop.f32.mrf.mxu1 }
  0xdf   :  { %v346_v63 = vmax.f32 %v338_v42, 0.0  ;;  %v336_v1 = vadd.f32 %v317_v10, %v1814_v39 }
  0xe0   :  { %v1791_v12 = vpop.f32.mrf.mxu0  ;;  %v1459_v13 = vpop.f32.mrf.mxu1 }
  0xe1   :  { %v339_v37 = vadd.f32 %v1459_v13, %v1803_v28  ;;  %v344_v59 = vmax.f32 %v336_v1, 0.0 }
  0xe2   :  { %v1793_v15 = vpop.f32.mrf.mxu0  ;;  %v320_v16 = vpop.f32.mrf.mxu1 }
  0xe3   :  { %v347_v50 = vmax.f32 %v339_v37, 0.0  ;;  %v337_v51 = vadd.f32 %v320_v16, %v1811_v36  ;;  %v335_v16 = vadd.f32 %v1455_v4, %v1820_v44  ;;  %v526_v6 = vadd.f32 %v1793_v15, %v1807_v32 }
  0xe4   :  { %v1795_v17 = vpop.f32.mrf.mxu0  ;;  %v1464_v18 = vpop.f32.mrf.mxu1 }
  0xe5   :  { %v428_v58 = vadd.f32 %v1464_v18, %v1824_v49  ;;  %v351_v20 = vpack.c.bf16 %v347_v50, %v346_v63  ;;  %v345_v23 = vmax.f32 %v337_v51, 0.0  ;;  %v334_v18 = vadd.f32 %v1779_v0, %v1824_v49 }
  0xe6   :  { %v1797_v21 = vpop.f32.mrf.mxu0  ;;  %v395_v22 = vpop.f32.mrf.mxu1  ;;  %v341_v50 = vmax.f32 %v333_v34, 0.0  ;;  %v1857_v63 = vadd.f32 %v1783_v5, %v1824_v49 }
  0xe7   :  { %v436_v4 = vmax.f32 %v428_v58, 0.0  ;;  %v350_v42 = vpack.c.bf16 %v345_v23, %v344_v59 }
  0xe8   :  { %v1799_v24 = vpop.f32.mrf.mxu0  ;;  %v1465_v25 = vpop.f32.mrf.mxu1 }
  0xe9   :  { %v429_v54 = vadd.f32 %v1465_v25, %v1820_v44 }
  0xea   :  { %v1801_v27 = vpop.f32.mrf.mxu0  ;;  %v398_v29 = vpop.f32.mrf.mxu1 }
  0xeb   :  { %v437_v61 = vmax.f32 %v429_v54, 0.0  ;;  %v427_v30 = vadd.f32 %v398_v29, %v1829_v62  ;;  %v343_v29 = vmax.f32 %v335_v16, 0.0 }
  0xec   :  { %v1805_v31 = vpop.f32.mrf.mxu0  ;;  %v1468_v33 = vpop.f32.mrf.mxu1 }
  0xed   :  { %v432_v40 = vadd.f32 %v1468_v33, %v1807_v32  ;;  %v435_v0 = vmax.f32 %v427_v30, 0.0 }
  0xee   :  { %v1809_v35 = vpop.f32.mrf.mxu0  ;;  %v411_v38 = vpop.f32.mrf.mxu1 }
  0xef   :  { %v430_v46 = vadd.f32 %v411_v38, %v1814_v39  ;;  %v440_v55 = vmax.f32 %v432_v40, 0.0  ;;  %v426_v38 = vadd.f32 %v395_v22, %v1836_v14  ;;  %v332_v40 = vadd.f32 %v1781_v2, %v1836_v14 }
  0xf0   :  { %v1817_v41 = vpop.f32.mrf.mxu0  ;;  %v1469_v43 = vpop.f32.mrf.mxu1  ;;  %v527_v2 = vadd.f32 %v1797_v21, %v1803_v28  ;;  %v524_v21 = vadd.f32 %v1795_v17, %v1814_v39 }
  0xf1   :  { %v433_v47 = vadd.f32 %v1469_v43, %v1803_v28  ;;  %v438_v8 = vmax.f32 %v430_v46, 0.0  ;;  %v443_v46 = vpack.c.bf16 %v437_v61, %v436_v4  ;;  %v434_v53 = vmax.f32 %v426_v38, 0.0 }
  0xf2   :  { %v1498_v48 = vpop.f32.mrf.mxu0  ;;  %v414_v52 = vpop.f32.mrf.mxu1  ;;  %v340_v54 = vmax.f32 %v332_v40, 0.0  ;;  %v535_v16 = vmax.f32 %v527_v2, 0.0  ;;  %v525_v61 = vadd.f32 %v1799_v24, %v1811_v36  ;;  %v523_v24 = vadd.f32 %v1789_v9, %v1820_v44 }
  0xf3   :  { %v441_v56 = vmax.f32 %v433_v47, 0.0  ;;  %v431_v57 = vadd.f32 %v414_v52, %v1811_v36  ;;  %v342_v47 = vmax.f32 %v334_v18, 0.0  ;;  %v714_v51 = vadd.f32 %v1498_v48, %v1807_v32 }
  0xf4   :  { %v693_v60 = vpop.f32.mrf.mxu0  ;;  %v1832_v3 = vpop.f32.mrf.mxu1  ;;  %v442_v15 = vpack.c.bf16 %v435_v0, %v434_v53  ;;  %v348_v58 = vpack.c.bf16 %v341_v50, %v340_v54  ;;  %v708_v0 = vadd.f32 %v1805_v31, %v1836_v14  ;;  %v531_v50 = vmax.f32 %v523_v24, 0.0 }
  0xf5   :  { %v445_v11 = vpack.c.bf16 %v441_v56, %v440_v55  ;;  %v439_v13 = vmax.f32 %v431_v57, 0.0  ;;  %v349_v55 = vpack.c.bf16 %v343_v29, %v342_v47  ;;  %v616_v59 = vadd.f32 %v1832_v3, %v1824_v49 }
  0xf6   :  { %v1839_v25 = vpop.f32.mrf.mxu1  ;;  %v1499_v33 = vpop.f32.mrf.mxu0  ;;  %v533_v29 = vmax.f32 %v525_v61, 0.0  ;;  %v716_v2 = vmax.f32 %v708_v0, 0.0 }
  0xf7   :  { %v444_v10 = vpack.c.bf16 %v439_v13, %v438_v8  ;;  %825 = vmatprep.subr.bf16.mxu1 %v445_v11  ;;  %v715_v43 = vadd.f32 %v1499_v33, %v1803_v28  ;;  %v534_v8 = vmax.f32 %v526_v6, 0.0  ;;  %v722_v11 = vmax.f32 %v714_v51, 0.0 }
  0xf8   :  { %v1485_v37 = vpop.f32.mrf.mxu1  ;;  %826 = vmatpush1.bf16.msra.mxu1 %v351_v20  ;;  %v696_v52 = vpop.f32.mrf.mxu0  ;;  %v712_v20 = vadd.f32 %v693_v60, %v1814_v39  ;;  %v624_v47 = vmax.f32 %v616_v59, 0.0  ;;  %v521_v6 = vadd.f32 %v1791_v12, %v1829_v62 }
  0xf9   :  { %827 = vmatprep.subr.bf16.mxu1 %v444_v10  ;;  %v723_v56 = vmax.f32 %v715_v43, 0.0  ;;  %v713_v48 = vadd.f32 %v696_v52, %v1811_v36  ;;  %v617_v30 = vadd.f32 %v1485_v37, %v1820_v44  ;;  %v539_v40 = vpack.c.bf16 %v535_v16, %v534_v8 }
  0xfa   :  { %v586_v45 = vpop.f32.mrf.mxu1  ;;  %v720_v37 = vmax.f32 %v712_v20, 0.0  ;;  %v709_v43 = vadd.f32 %v1817_v41, %v1829_v62  ;;  %v614_v41 = vadd.f32 %v1839_v25, %v1836_v14  ;;  %v1547_v25 = vld [vmem:[%s2056_s4 + $0x8] sm:$0xff]   ;;  %v529_v12 = vmax.f32 %v521_v6, 0.0 }
  0xfb   :  { %v727_v17 = vpack.c.bf16 %v723_v56, %v722_v11  ;;  %v721_v33 = vmax.f32 %v713_v48, 0.0  ;;  %v625_v9 = vmax.f32 %v617_v30, 0.0 }
  0xfc   :  { %v1488_v22 = vpop.f32.mrf.mxu1  ;;  %828 = vmatpush1.bf16.msra.mxu1 %v350_v42  ;;  %v622_v54 = vmax.f32 %v614_v41, 0.0 }
  0xfd   :  { %829 = vmatprep.subr.bf16.mxu1 %v443_v46  ;;  %v620_v1 = vadd.f32 %v1488_v22, %v1807_v32  ;;  %v711_v32 = vadd.f32 %v1809_v35, %v1820_v44  ;;  %v710_v35 = vadd.f32 %v1801_v27, %v1824_v49  ;;  %v615_v44 = vadd.f32 %v586_v45, %v1829_v62 }
  0xfe   :  { %v599_v57 = vpop.f32.mrf.mxu1  ;;  %v726_v46 = vpack.c.bf16 %v721_v33, %v720_v37  ;;  %v530_v49 = vmax.f32 %v1857_v63, 0.0  ;;  %v520_v45 = vadd.f32 %v1787_v7, %v1836_v14  ;;  %v717_v22 = vmax.f32 %v709_v43, 0.0  ;;  %v1549_v63 = vld [vmem:[%s2056_s4 + $0x18] sm:$0xff]  }
  0xff   :  { %v618_v23 = vadd.f32 %v599_v57, %v1814_v39  ;;  %v628_v18 = vmax.f32 %v620_v1, 0.0  ;;  %v532_v39 = vmax.f32 %v524_v21, 0.0  ;;  %v719_v42 = vmax.f32 %v711_v32, 0.0  ;;  %v1548_v57 = vld [vmem:[%s2056_s4 + $0x10] sm:$0xff]   ;;  %v1937_v32 = vpop.permute.xlu0 %776 }
 0x100   :  { %v1489_v13 = vpop.f32.mrf.mxu1  ;;  %830 = vmatpush1.bf16.msra.mxu1 %v349_v55  ;;  %v718_v3 = vmax.f32 %v710_v35, 0.0  ;;  %v631_v53 = vpack.c.bf16 %v625_v9, %v624_v47  ;;  %v623_v31 = vmax.f32 %v615_v44, 0.0  ;;  %v528_v7 = vmax.f32 %v520_v45, 0.0 }
 0x101   :  { %v621_v5 = vadd.f32 %v1489_v13, %v1803_v28  ;;  %831 = vmatprep.subr.bf16.mxu1 %v442_v15  ;;  %v1875_v28 = vld [vmem:[%s2056_s4] sm:$0xff]   ;;  %v626_v4 = vmax.f32 %v618_v23, 0.0  ;;  %v538_v51 = vpack.c.bf16 %v533_v29, %v532_v39  ;;  %v537_v14 = vpack.c.bf16 %v531_v50, %v530_v49  ;;  %v1933_v23 = vpop.permute.xlu1 %781 }
 0x102   :  { %v602_v10 = vpop.f32.mrf.mxu1  ;;  %v725_v52 = vpack.c.bf16 %v719_v42, %v718_v3  ;;  %v724_v62 = vpack.c.bf16 %v717_v22, %v716_v2  ;;  %v630_v55 = vpack.c.bf16 %v623_v31, %v622_v54  ;;  %v536_v56 = vpack.c.bf16 %v529_v12, %v528_v7 }
 0x103   :  { %v629_v34 = vmax.f32 %v621_v5, 0.0  ;;  %v619_v60 = vadd.f32 %v602_v10, %v1811_v36 }
 0x104   :  { %832 = vmatpush1.bf16.msra.mxu1 %v348_v58 }
 0x105   :  { %v633_v38 = vpack.c.bf16 %v629_v34, %v628_v18  ;;  %v627_v36 = vmax.f32 %v619_v60, 0.0  ;;  %1500 = vmatprep.subr.bf16.mxu1 %v727_v17  ;;  %v1943_v33 = vpop.permute.xlu1 %771  ;;  %v1947_v60 = vpop.permute.xlu0 %766 }
 0x107   :  { %v632_v27 = vpack.c.bf16 %v627_v36, %v626_v4  ;;  %1379 = vmatmul.mubr.msk.bf16.vlgmr.msra.gmra.mxu1 %vm804_vm1, %v1875_v28  ;;  %898 = vmatprep.subr.bf16.mxu0 %v633_v38 }
 0x108   :  { %899 = vmatpush1.bf16.msra.mxu0 %v539_v40  ;;  %1501 = vmatpush3.bf16.msra.mxu1 %v727_v17 }
 0x109   :  { %900 = vmatprep.subr.bf16.mxu0 %v632_v27  ;;  %1502 = vmatprep.subr.bf16.mxu1 %v726_v46  ;;  %v1953_v59 = vpop.permute.xlu1 %761  ;;  %v1961_v42 = vpop.permute.xlu0 %756 }
 0x10a   :  { %859 = vmatprep.mubr.bf16.mxu1 %v1594_v26 }
 0x10c   :  { %901 = vmatpush1.bf16.msra.mxu0 %v538_v51  ;;  %1503 = vmatpush3.bf16.msra.mxu1 %v726_v46 }
 0x10d   :  { %902 = vmatprep.subr.bf16.mxu0 %v631_v53  ;;  %1504 = vmatprep.subr.bf16.mxu1 %v725_v52 }
 0x10f   :  { %1380 = vmatmul.mubr.msk.bf16.gmra.mxu1 %vm804_vm1, %v1547_v25 }
 0x110   :  { %903 = vmatpush1.bf16.msra.mxu0 %v537_v14  ;;  %1505 = vmatpush3.bf16.msra.mxu1 %v725_v52  ;;  %v1974_v52 = vpop.permute.xlu1 %751 }
 0x111   :  { %904 = vmatprep.subr.bf16.mxu0 %v630_v55  ;;  %1506 = vmatprep.subr.bf16.mxu1 %v724_v62 }
 0x112   :  { %869 = vmatprep.mubr.bf16.mxu1 %v1594_v26 }
 0x114   :  { %905 = vmatpush1.bf16.msra.mxu0 %v536_v56  ;;  %1507 = vmatpush3.bf16.msra.mxu1 %v724_v62  ;;  %v1981_v62 = vpop.permute.xlu0 %746 }
 0x117   :  { %1381 = vmatmul.mubr.msk.bf16.gmra.mxu1 %vm804_vm1, %v1548_v57  ;;  %1383 = vmatmul.mubr.msk.bf16.vlgmr.msra.gmra.mxu0 %vm804_vm1, %v1875_v28 }
 0x118   :  { %879 = vmatprep.mubr.bf16.mxu1 %v1594_v26  ;;  %932 = vmatprep.mubr.bf16.mxu0 %v1594_v26 }
 0x11f   :  { %1382 = vmatmul.mubr.msk.bf16.gmra.mxu1 %vm804_vm1, %v1549_v63  ;;  %1384 = vmatmul.mubr.msk.bf16.gmra.mxu0 %vm804_vm1, %v1547_v25 }
 0x120   :  { %942 = vmatprep.mubr.bf16.mxu0 %v1594_v26  ;;  %1508 = vmatprep.mubr.msk.bf16.mxu1 %vm804_vm1, %v1875_v28 }
 0x127   :  { %1385 = vmatmul.mubr.msk.bf16.gmra.mxu0 %vm804_vm1, %v1548_v57  ;;  %1509 = vmatmul.mubr.msk.bf16.vlgmr.msra.gmra.mxu1 %vm804_vm1, %v1547_v25 }
 0x128   :  { %952 = vmatprep.mubr.bf16.mxu0 %v1594_v26  ;;  %1512 = vmatprep.mubr.msk.bf16.mxu1 %vm804_vm1, %v1548_v57 }
 0x12f   :  { %1386 = vmatmul.mubr.msk.bf16.gmra.mxu0 %vm804_vm1, %v1549_v63  ;;  %1513 = vmatmul.mubr.msk.bf16.gmra.mxu1 %vm804_vm1, %v1549_v63 }
 0x130   :  { %1130 = vmatprep.mubr.bf16.mxu0 %v1594_v26  ;;  %1171 = vmatprep.mubr.bf16.mxu1 %v1594_v26 }
 0x1c7   :  { %v1927_v15 = vpop.f32.mrf.mxu1 }
 0x1c9   :  { %v853_v48 = vpop.f32.mrf.mxu1 }
 0x1ca   :  { %v854_v57 = vadd.f32 %v853_v48, %v1981_v62 }
 0x1cb   :  { %v1929_v1 = vpop.f32.mrf.mxu1 }
 0x1cd   :  { %v857_v58 = vpop.f32.mrf.mxu1 }
 0x1ce   :  { %v858_v25 = vadd.f32 %v857_v58, %v1974_v52  ;;  %v856_v58 = vadd.f32 %v1929_v1, %v1974_v52 }
 0x1cf   :  { %v861_v8 = vpop.f32.mrf.mxu1 }
 0x1d0   :  { %v862_v63 = vadd.f32 %v861_v8, %v1961_v42  ;;  %v1029_v8 = vmax.f32 %v854_v57, 0.0 }
 0x1d1   :  { %v863_v21 = vpop.f32.mrf.mxu1 }
 0x1d2   :  { %v864_v22 = vadd.f32 %v863_v21, %v1961_v42 }
 0x1d3   :  { %v865_v11 = vpop.f32.mrf.mxu1 }
 0x1d4   :  { %v866_v2 = vadd.f32 %v865_v11, %v1953_v59  ;;  %v1039_v11 = vmax.f32 %v864_v22, 0.0 }
 0x1d5   :  { %v867_v13 = vpop.f32.mrf.mxu1 }
 0x1d6   :  { %v868_v3 = vadd.f32 %v867_v13, %v1953_v59 }
 0x1d7   :  { %v871_v16 = vpop.f32.mrf.mxu1  ;;  %v1931_v20 = vpop.f32.mrf.mxu0 }
 0x1d8   :  { %v872_v45 = vadd.f32 %v871_v16, %v1947_v60  ;;  %v1044_v55 = vmax.f32 %v868_v3, 0.0 }
 0x1d9   :  { %v873_v5 = vpop.f32.mrf.mxu1  ;;  %v1935_v61 = vpop.f32.mrf.mxu0 }
 0x1da   :  { %v874_v43 = vadd.f32 %v873_v5, %v1947_v60  ;;  %v1048_v21 = vmax.f32 %v872_v45, 0.0  ;;  %v852_v5 = vadd.f32 %v1927_v15, %v1981_v62 }
 0x1db   :  { %v875_v26 = vpop.f32.mrf.mxu1  ;;  %v1939_v30 = vpop.f32.mrf.mxu0 }
 0x1dc   :  { %v876_v44 = vadd.f32 %v875_v26, %v1943_v33  ;;  %v1049_v53 = vmax.f32 %v874_v43, 0.0  ;;  %v1034_v26 = vmax.f32 %v858_v25, 0.0 }
 0x1dd   :  { %v877_v17 = vpop.f32.mrf.mxu1  ;;  %v1941_v10 = vpop.f32.mrf.mxu0 }
 0x1de   :  { %v878_v37 = vadd.f32 %v877_v17, %v1943_v33  ;;  %v1053_v54 = vmax.f32 %v876_v44, 0.0  ;;  %v1043_v17 = vmax.f32 %v866_v2, 0.0  ;;  %v1069_v1 = vpack.c.bf16 %v1034_v26, %v1029_v8 }
 0x1df   :  { %v881_v18 = vpop.f32.mrf.mxu1  ;;  %v1945_v34 = vpop.f32.mrf.mxu0 }
 0x1e0   :  { %v882_v36 = vadd.f32 %v881_v18, %v1937_v32  ;;  %v1054_v0 = vmax.f32 %v878_v37, 0.0  ;;  %v1078_v18 = vpack.c.bf16 %v1053_v54, %v1048_v21  ;;  %v1038_v37 = vmax.f32 %v862_v63, 0.0 }
 0x1e1   :  { %v883_v28 = vpop.f32.mrf.mxu1  ;;  %v1949_v24 = vpop.f32.mrf.mxu0 }
 0x1e2   :  { %v884_v4 = vadd.f32 %v883_v28, %v1937_v32  ;;  %v1058_v50 = vmax.f32 %v882_v36, 0.0  ;;  %v1079_v56 = vpack.c.bf16 %v1054_v0, %v1049_v53  ;;  %v1033_v36 = vmax.f32 %v856_v58, 0.0 }
 0x1e3   :  { %v885_v39 = vpop.f32.mrf.mxu1  ;;  %v1951_v35 = vpop.f32.mrf.mxu0  ;;  %v1073_v43 = vpack.c.bf16 %v1043_v17, %v1038_v37  ;;  %v937_v53 = vadd.f32 %v1949_v24, %v1961_v42 }
 0x1e4   :  { %v886_v38 = vadd.f32 %v885_v39, %v1933_v23  ;;  %v1059_v47 = vmax.f32 %v884_v4, 0.0  ;;  %v1074_v39 = vpack.c.bf16 %v1044_v55, %v1039_v11 }
 0x1e5   :  { %v887_v40 = vpop.f32.mrf.mxu1  ;;  %v1959_v29 = vpop.f32.mrf.mxu0 }
 0x1e6   :  { %v888_v9 = vadd.f32 %v887_v40, %v1933_v23  ;;  %v1063_v46 = vmax.f32 %v886_v38, 0.0  ;;  %v1028_v40 = vmax.f32 %v852_v5, 0.0 }
 0x1e7   :  { %v1966_v27 = vpop.f32.mrf.mxu0  ;;  %v1968_v49 = vpop.f32.mrf.mxu1 }
 0x1e8   :  { %v1064_v41 = vmax.f32 %v888_v9, 0.0  ;;  %v1083_v7 = vpack.c.bf16 %v1063_v46, %v1058_v50  ;;  %v1068_v22 = vpack.c.bf16 %v1033_v36, %v1028_v40  ;;  %v945_v24 = vadd.f32 %v1966_v27, %v1947_v60 }
 0x1e9   :  { %v946_v6 = vpop.f32.mrf.mxu0  ;;  %v1972_v51 = vpop.f32.mrf.mxu1 }
 0x1ea   :  { %v1084_v31 = vpack.c.bf16 %v1064_v41, %v1059_v47  ;;  %v998_v40 = vadd.f32 %v1972_v51, %v1981_v62 }
 0x1eb   :  { %v948_v14 = vpop.f32.mrf.mxu0  ;;  %v1979_v12 = vpop.f32.mrf.mxu1 }
 0x1ec   :  { %1106 = vmatprep.subr.bf16.mxu0 %v1084_v31  ;;  %v947_v31 = vadd.f32 %v946_v6, %v1947_v60  ;;  %v949_v2 = vadd.f32 %v948_v14, %v1943_v33  ;;  %v1088_v14 = vld [vmem:[%s2058_s6] sm:$0x7]  ;;  %s1596_s6 = smov [#allocation2]  }
 0x1ed   :  { %v950_v13 = vpop.f32.mrf.mxu0  ;;  %v1985_v16 = vpop.f32.mrf.mxu1  ;;  %1107 = vmatpush1.bf16.msra.mxu0 %v1083_v7  ;;  %s1333_s14 = sshll.u32 %s1596_s6, 4  ;;  %s1334_s14 = int_to_ptr.vmem [resolvable:$true] %s1333_s14 }
 0x1ee   :  { %1108 = vmatprep.subr.bf16.mxu0 %v1079_v56  ;;  %v951_v15 = vadd.f32 %v950_v13, %v1943_v33  ;;  %v1051_v13 = vmax.f32 %v947_v31, 0.0  ;;  %v1055_v27 = vmax.f32 %v949_v2, 0.0  ;;  %s1570_s15 = scalar_lea.vmem %s1334_s14, 128  ;;  %p1575_p1 = scmp.lt.s32.totalorder %s1334_s14, %s1334_s14 }
 0x1ef   :  { %v954_v28 = vpop.f32.mrf.mxu0  ;;  %v1514_v48 = vpop.f32.mrf.mxu1  ;;  %p1571_p0 = scmp.ne.s32.totalorder %s1334_s14, %s1570_s15  ;;  %p1576_p2 = scmp.lt.s32.totalorder %s1570_s15, %s1570_s15 }
 0x1f0   :  { %v955_v47 = vadd.f32 %v954_v28, %v1937_v32  ;;  %v1022_v41 = vadd.f32 %v1514_v48, %v1937_v32  ;;  %v1056_v56 = vmax.f32 %v951_v15, 0.0  ;;  %v1050_v28 = vmax.f32 %v945_v24, 0.0 }
 0x1f1   :  { %v956_v4 = vpop.f32.mrf.mxu0  ;;  %v1013_v38 = vpop.f32.mrf.mxu1  ;;  %1109 = vmatpush1.bf16.msra.mxu0 %v1078_v18  ;;  %v927_v48 = vadd.f32 %v1935_v61, %v1981_v62  ;;  %v925_v61 = vadd.f32 %v1931_v20, %v1981_v62  ;;  %p1577_p3 = por %p1576_p2, %p1575_p1 }
 0x1f2   :  { %1110 = vmatprep.subr.bf16.mxu0 %v1074_v39  ;;  %v957_v46 = vadd.f32 %v956_v4, %v1937_v32  ;;  %v941_v32 = vadd.f32 %v1959_v29, %v1953_v59  ;;  %v1060_v21 = vmax.f32 %v955_v47, 0.0  ;;  %v1062_v6 = vmax.f32 %v1022_v41, 0.0  ;;  %v1093_v62 = vpop.permute.xlu0 %1092 }
 0x1f3   :  { %v958_v9 = vpop.f32.mrf.mxu0  ;;  %v1515_v44 = vpop.f32.mrf.mxu1  ;;  %v1009_v29 = vadd.f32 %v1979_v12, %v1953_v59  ;;  %v1081_v18 = vpack.c.bf16 %v1056_v56, %v1051_v13  ;;  %v1041_v39 = vmax.f32 %v937_v53, 0.0  ;;  %v1080_v37 = vpack.c.bf16 %v1055_v27, %v1050_v28  ;;  %p1578_p4 = pnand %p1577_p3, %p1571_p0 }
 0x1f4   :  { %v959_v3 = vadd.f32 %v958_v9, %v1933_v23  ;;  %v1025_v0 = vadd.f32 %v1515_v44, %v1933_v23  ;;  %v1061_v57 = vmax.f32 %v957_v46, 0.0  ;;  %v1046_v17 = vmax.f32 %v941_v32, 0.0 }
 0x1f5   :  { %v960_v45 = vpop.f32.mrf.mxu0  ;;  %v1016_v50 = vpop.f32.mrf.mxu1  ;;  %1111 = vmatpush1.bf16.msra.mxu0 %v1073_v43  ;;  %v1001_v4 = vadd.f32 %v1985_v16, %v1974_v52  ;;  %v1030_v15 = vmax.f32 %v925_v61, 0.0  ;;  %v1032_v46 = vmax.f32 %v998_v40, 0.0 }
 0x1f6   :  { %v961_v25 = vadd.f32 %v960_v45, %v1933_v23  ;;  %1112 = vmatprep.subr.bf16.mxu0 %v1069_v1  ;;  %v1065_v54 = vmax.f32 %v959_v3, 0.0  ;;  %v1067_v7 = vmax.f32 %v1025_v0, 0.0  ;;  %v1017_v55 = vadd.f32 %v1016_v50, %v1943_v33 }
 0x1f7   :  { %v1014_v23 = vadd.f32 %v1013_v38, %v1947_v60  ;;  %v939_v33 = vadd.f32 %v1951_v35, %v1953_v59  ;;  %v931_v60 = vadd.f32 %v1941_v10, %v1974_v52  ;;  %v935_v35 = vadd.f32 %v1945_v34, %v1961_v42 }
 0x1f8   :  { %v1066_v63 = vmax.f32 %v961_v25, 0.0  ;;  %v1085_v11 = vpack.c.bf16 %v1065_v54, %v1060_v21  ;;  %v1087_v5 = vpack.c.bf16 %v1067_v7, %v1062_v6  ;;  %v1057_v26 = vmax.f32 %v1017_v55, 0.0 }
 0x1f9   :  { %1113 = vmatpush1.bf16.msra.mxu0 %v1068_v22  ;;  %v1006_v59 = vadd.f32 %v1968_v49, %v1961_v42  ;;  %v1052_v12 = vmax.f32 %v1014_v23, 0.0  ;;  %v929_v10 = vadd.f32 %v1939_v30, %v1974_v52  ;;  %v1045_v8 = vmax.f32 %v939_v33, 0.0 }
 0x1fa   :  { %v1086_v58 = vpack.c.bf16 %v1066_v63, %v1061_v57  ;;  %1516 = vmatprep.subr.bf16.mxu0 %v1593_v19  ;;  %v1047_v34 = vmax.f32 %v1009_v29, 0.0  ;;  %v1036_v49 = vmax.f32 %v931_v60, 0.0  ;;  %v1076_v38 = vpack.c.bf16 %v1046_v17, %v1041_v39 }
 0x1fb   :  { %v1082_v42 = vpack.c.bf16 %v1057_v26, %v1052_v12  ;;  %v1040_v30 = vmax.f32 %v935_v35, 0.0  ;;  %v1042_v36 = vmax.f32 %v1006_v59, 0.0  ;;  %v1031_v1 = vmax.f32 %v927_v48, 0.0 }
 0x1fc   :  { %1391 = vmatmul.mubr.msk.bf16.vlgmr.msra.gmra.mxu0 %vm804_vm1, %v1088_v14  ;;  %1147 = vmatprep.subr.bf16.mxu1 %v1086_v58  ;;  %v1035_v52 = vmax.f32 %v929_v10, 0.0  ;;  %v1037_v9 = vmax.f32 %v1001_v4, 0.0 }
 0x1fd   :  { %1148 = vmatpush1.bf16.msra.mxu1 %v1085_v11  ;;  %1517 = vmatpush3.bf16.msra.mxu0 %v1087_v5  ;;  %v1075_v16 = vpack.c.bf16 %v1045_v8, %v1040_v30  ;;  %v1077_v43 = vpack.c.bf16 %v1047_v34, %v1042_v36  ;;  %v1071_v44 = vpack.c.bf16 %v1036_v49, %v1031_v1 }
 0x1fe   :  { %1149 = vmatprep.subr.bf16.mxu1 %v1081_v18  ;;  %1518 = vmatprep.subr.bf16.mxu0 %v1593_v19  ;;  %v1070_v20 = vpack.c.bf16 %v1035_v52, %v1030_v15  ;;  %v1072_v51 = vpack.c.bf16 %v1037_v9, %v1032_v46 }
 0x1ff   :  { %1524 = vmatprep.mubr.msk.bf16.mxu0 %vm1595_vm3, %v1593_v19 }
 0x201   :  { %1150 = vmatpush1.bf16.msra.mxu1 %v1080_v37  ;;  %1519 = vmatpush3.bf16.msra.mxu0 %v1082_v42 }
 0x202   :  { %1151 = vmatprep.subr.bf16.mxu1 %v1076_v38  ;;  %1520 = vmatprep.subr.bf16.mxu0 %v1593_v19 }
 0x205   :  { %1152 = vmatpush1.bf16.msra.mxu1 %v1075_v16  ;;  %1521 = vmatpush3.bf16.msra.mxu0 %v1077_v43 }
 0x206   :  { %1153 = vmatprep.subr.bf16.mxu1 %v1071_v44  ;;  %1522 = vmatprep.subr.bf16.mxu0 %v1593_v19 }
 0x209   :  { %1154 = vmatpush1.bf16.msra.mxu1 %v1070_v20  ;;  %1523 = vmatpush3.bf16.msra.mxu0 %v1072_v51 }
 0x20c   :  { %1392 = vmatmul.mubr.msk.bf16.vlgmr.msra.gmra.mxu1 %vm804_vm1, %v1088_v14  ;;  %1525 = vmatmul.mubr.msk.bf16.vlgmr.msra.gmra.mxu0 %vm804_vm1, %v1088_v14 }
 0x2bc   :  { %v1132_v3 = vpop.f32.mrf.mxu0 }
 0x2bd   :  { %v1133_v0 = vadd.f32 %v1132_v3, %v1093_v62 }
 0x2be   :  { %v1134_v47 = vpop.f32.mrf.mxu0 }
 0x2bf   :  { %v1221_v41 = vsel %vm1220_vm6, %v1133_v0, -inf  ;;  %v1135_v45 = vadd.f32 %v1134_v47, %v1093_v62 }
 0x2c0   :  { %v1222_v50 = vrot.slane %v1221_v41, 4  ;;  %v1136_v22 = vpop.f32.mrf.mxu0 }
 0x2c1   :  { %v1228_v19 = vsel %vm1220_vm6, %v1135_v45, -inf }
 0x2c2   :  { %v1223_v53 = vmax.f32 %v1221_v41, %v1222_v50  ;;  %v1229_v31 = vrot.slane %v1228_v19, 4  ;;  %v1137_v25 = vpop.f32.mrf.mxu0 }
 0x2c4   :  { %v1224_v2 = vrot.slane %v1223_v53, 2  ;;  %v1230_v54 = vmax.f32 %v1228_v19, %v1229_v31 }
 0x2c6   :  { %v1225_v7 = vmax.f32 %v1223_v53, %v1224_v2  ;;  %v1231_v55 = vrot.slane %v1230_v54, 2 }
 0x2c8   :  { %v1226_v32 = vrot.slane %v1225_v7, 1  ;;  %v1232_v56 = vmax.f32 %v1230_v54, %v1231_v55 }
 0x2ca   :  { %v1227_v57 = vmax.f32 %v1225_v7, %v1226_v32  ;;  %v1233_v63 = vrot.slane %v1232_v56, 1 }
 0x2cc   :  { %v1256_v24 = vsub.f32 %v1133_v0, %v1227_v57  ;;  %v1234_v21 = vmax.f32 %v1232_v56, %v1233_v63  ;;  %v1173_v6 = vpop.f32.mrf.mxu1  ;;  %v1214_v23 = vpop.f32.mrf.mxu0 }
 0x2cd   :  { %v1174_v14 = vadd.f32 %v1173_v6, %v1093_v62  ;;  %v1215_v33 = vadd.f32 %v1214_v23, %v1093_v62 }
 0x2ce   :  { %v1261_v13 = vmul.f32 1.442695, %v1256_v24  ;;  %v1257_v29 = vsub.f32 %v1135_v45, %v1234_v21  ;;  %v1175_v58 = vpop.f32.mrf.mxu1  ;;  %v1526_v27 = vpop.f32.mrf.mxu0 }
 0x2cf   :  { %v1235_v11 = vsel %vm1220_vm6, %v1174_v14, -inf  ;;  %v1249_v5 = vsel %vm1220_vm6, %v1215_v33, -inf  ;;  %v1176_v26 = vadd.f32 %v1175_v58, %v1093_v62 }
 0x2d0   :  { %1550 = vpow2.f32 %v1261_v13  ;;  %v1263_v60 = vmul.f32 1.442695, %v1257_v29  ;;  %v1236_v17 = vrot.slane %v1235_v11, 4  ;;  %v1250_v18 = vrot.slane %v1249_v5, 4  ;;  %v1177_v35 = vpop.f32.mrf.mxu1  ;;  %v1217_v28 = vpop.f32.mrf.mxu0 }
 0x2d1   :  { %v1242_v59 = vsel %vm1220_vm6, %v1176_v26, -inf }
 0x2d2   :  { %1552 = vpow2.f32 %v1263_v60  ;;  %v1237_v12 = vmax.f32 %v1235_v11, %v1236_v17  ;;  %v1251_v48 = vmax.f32 %v1249_v5, %v1250_v18  ;;  %v1243_v10 = vrot.slane %v1242_v59, 4  ;;  %v1178_v39 = vpop.f32.mrf.mxu1  ;;  %v1527_v8 = vpop.f32.mrf.mxu0 }
 0x2d4   :  { %v1238_v37 = vrot.slane %v1237_v12, 2  ;;  %v1252_v34 = vrot.slane %v1251_v48, 2  ;;  %v1244_v4 = vmax.f32 %v1242_v59, %v1243_v10 }
 0x2d6   :  { %v1239_v42 = vmax.f32 %v1237_v12, %v1238_v37  ;;  %v1253_v49 = vmax.f32 %v1251_v48, %v1252_v34  ;;  %v1245_v38 = vrot.slane %v1244_v4, 2 }
 0x2d8   :  { %v1240_v61 = vrot.slane %v1239_v42, 1  ;;  %v1254_v30 = vrot.slane %v1253_v49, 1  ;;  %v1246_v36 = vmax.f32 %v1244_v4, %v1245_v38 }
 0x2da   :  { %v1241_v40 = vmax.f32 %v1239_v42, %v1240_v61  ;;  %v1255_v1 = vmax.f32 %v1253_v49, %v1254_v30  ;;  %v1247_v52 = vrot.slane %v1246_v36, 1 }
 0x2dc   :  { %v1258_v16 = vsub.f32 %v1174_v14, %v1241_v40  ;;  %v1260_v43 = vsub.f32 %v1215_v33, %v1255_v1  ;;  %v1248_v9 = vmax.f32 %v1246_v36, %v1247_v52 }
 0x2dd   :  { %v1551_v44 = vpop.eup %1550 }
 0x2de   :  { %v1271_v15 = vsel %vm1220_vm6, %v1551_v44, 0.0  ;;  %v1265_v46 = vmul.f32 1.442695, %v1258_v16  ;;  %v1269_v20 = vmul.f32 1.442695, %v1260_v43  ;;  %v1259_v51 = vsub.f32 %v1176_v26, %v1248_v9 }
 0x2df   :  { %v1553_v62 = vpop.eup %1552  ;;  %v1272_v3 = vrot.slane %v1271_v15, 4 }
 0x2e0   :  { %v1278_v0 = vsel %vm1220_vm6, %v1553_v62, 0.0  ;;  %1554 = vpow2.f32 %v1265_v46  ;;  %v1267_v47 = vmul.f32 1.442695, %v1259_v51 }
 0x2e1   :  { %v1273_v41 = vadd.f32 %v1272_v3, %v1271_v15  ;;  %v1279_v45 = vrot.slane %v1278_v0, 4  ;;  %1556 = vpow2.f32 %v1269_v20 }
 0x2e2   :  { %1558 = vpow2.f32 %v1267_v47 }
 0x2e3   :  { %v1280_v50 = vadd.f32 %v1279_v45, %v1278_v0  ;;  %v1274_v22 = vrot.slane %v1273_v41, 2 }
 0x2e5   :  { %v1281_v19 = vrot.slane %v1280_v50, 2  ;;  %v1275_v31 = vadd.f32 %v1274_v22, %v1273_v41 }
 0x2e7   :  { %v1282_v53 = vadd.f32 %v1281_v19, %v1280_v50  ;;  %v1276_v54 = vrot.slane %v1275_v31, 1 }
 0x2e9   :  { %v1283_v25 = vrot.slane %v1282_v53, 1  ;;  %v1277_v6 = vadd.f32 %v1276_v54, %v1275_v31 }
 0x2eb   :  { %v1284_v56 = vadd.f32 %v1283_v25, %v1282_v53 }
 0x2ed   :  { %v1555_v2 = vpop.eup %1554  ;;  %1560 = vrcp.f32 %v1284_v56 }
 0x2ee   :  { %v1557_v7 = vpop.eup %1556  ;;  %v1285_v55 = vsel %vm1220_vm6, %v1555_v2, 0.0  ;;  %1562 = vrcp.f32 %v1277_v6 }
 0x2ef   :  { %v1559_v32 = vpop.eup %1558  ;;  %v1286_v57 = vrot.slane %v1285_v55, 4  ;;  %v1299_v63 = vsel %vm1220_vm6, %v1557_v7, 0.0 }
 0x2f0   :  { %v1300_v24 = vrot.slane %v1299_v63, 4  ;;  %v1292_v21 = vsel %vm1220_vm6, %v1559_v32, 0.0 }
 0x2f1   :  { %v1287_v23 = vadd.f32 %v1286_v57, %v1285_v55  ;;  %v1293_v14 = vrot.slane %v1292_v21, 4 }
 0x2f2   :  { %v1301_v33 = vadd.f32 %v1300_v24, %v1299_v63 }
 0x2f3   :  { %v1288_v13 = vrot.slane %v1287_v23, 2  ;;  %v1294_v29 = vadd.f32 %v1293_v14, %v1292_v21 }
 0x2f4   :  { %v1302_v58 = vrot.slane %v1301_v33, 2 }
 0x2f5   :  { %v1289_v27 = vadd.f32 %v1288_v13, %v1287_v23  ;;  %v1295_v11 = vrot.slane %v1294_v29, 2 }
 0x2f6   :  { %v1303_v5 = vadd.f32 %v1302_v58, %v1301_v33 }
 0x2f7   :  { %v1290_v26 = vrot.slane %v1289_v27, 1  ;;  %v1296_v60 = vadd.f32 %v1295_v11, %v1294_v29 }
 0x2f8   :  { %v1304_v17 = vrot.slane %v1303_v5, 1 }
 0x2f9   :  { %v1291_v18 = vadd.f32 %v1290_v26, %v1289_v27  ;;  %v1297_v35 = vrot.slane %v1296_v60, 1 }
 0x2fa   :  { %v1305_v28 = vadd.f32 %v1304_v17, %v1303_v5  ;;  %v1561_v12 = vpop.eup %1560 }
 0x2fb   :  { %v1298_v59 = vadd.f32 %v1297_v35, %v1296_v60  ;;  %1564 = vrcp.f32 %v1291_v18  ;;  %v1563_v48 = vpop.eup %1562  ;;  %v1312_v10 = vmul.f32 %v1561_v12, %v1553_v62 }
 0x2fc   :  { %1566 = vrcp.f32 %v1305_v28  ;;  %v1311_v39 = vmul.f32 %v1563_v48, %v1551_v44 }
 0x2fd   :  { %1568 = vrcp.f32 %v1298_v59  ;;  %v1318_v8 = vmul.f32 0.175, %v1312_v10 }
 0x2fe   :  { %v1316_v42 = vmul.f32 0.175, %v1311_v39 }
 0x300   :  { %v1319_v30 = vadd.f32 %v1318_v8, %v1316_v42 }
 0x308   :  { %v1565_v37 = vpop.eup %1564 }
 0x309   :  { %v1567_v34 = vpop.eup %1566  ;;  %v1313_v4 = vmul.f32 %v1565_v37, %v1555_v2 }
 0x30a   :  { %v1569_v49 = vpop.eup %1568  ;;  %v1315_v61 = vmul.f32 %v1567_v34, %v1557_v7 }
 0x30b   :  { %v1314_v38 = vmul.f32 %v1569_v49, %v1559_v32  ;;  %v1320_v36 = vmul.f32 0.175, %v1313_v4 }
 0x30c   :  { %v1324_v16 = vmul.f32 0.3, %v1315_v61 }
 0x30d   :  { %v1321_v40 = vadd.f32 %v1320_v36, %v1319_v30  ;;  %v1322_v1 = vmul.f32 0.175, %v1314_v38 }
 0x30f   :  { %v1323_v52 = vadd.f32 %v1322_v1, %v1321_v40 }
 0x311   :  { %v1325_v43 = vadd.f32 %v1324_v16, %v1323_v52 }
 0x313   :  { %1326 = vst [vmem:[#allocation2] sm:$0x1f] %v1325_v43 }
 0x314   :  { %1581 = shalt.err (!%p1578_p4)
}
 0x315   :  { %1336 = dma.vmem_to_hbm [thread:$0]  %s1334_s14, 128, %s2060_s8, [#allocation3]  }
 0x316   :  { %1590 = dma.done.wait [#allocation3], 128  }
 0x317   :  { %1591 = vsyncadd [#allocation3], 4294967168 }
 0x318   :  { %1340 = vsyncpa [#allocation3], 1 }

</bundles_post_ra>
